<compile_context>
chip_gen: v7x
topology: tpu7x:2x2x1
jax: 0.10.0
libtpu: 0.0.40
codegen_flags: <defaults>
</compile_context>

<pallas_src>
import functools

import jax
import jax.numpy as jnp
import numpy as np
from jax.experimental import pallas as pl
from jax.experimental.pallas import tpu as pltpu

_C1_OUT = 16   # conv1 output channels (fixed by the module)
_C2_OUT = 32   # conv2 output channels (fixed by the module)
_HEAD_PAD = 128  # lane-dense output slab width


# ----------------------------------------------------------------------------
# Small helpers
# ----------------------------------------------------------------------------
def _conv_out(n, k, s):
    return (n - k) // s + 1


def _round_up(n, m):
    return ((n + m - 1) // m) * m


def _pad_rows(a, mult):
    r = a.shape[0]
    rp = _round_up(r, mult)
    if rp == r:
        return a
    return jnp.pad(a, ((0, rp - r), (0, 0)))


def _im2col_nchw(x, k, s):
    """Extract conv patches (pure layout plumbing, done in the wrapper).

    x: [B, C, H, W]  ->  [B, OH*OW, C*k*k]  with feature order (c, kh, kw),
    matching PyTorch's Conv2d weight.reshape(out, C*k*k) flattening.
    """
    B, C, H, W = x.shape
    OH = _conv_out(H, k, s)
    OW = _conv_out(W, k, s)
    cols = []
    for kh in range(k):
        for kw in range(k):
            cols.append(x[:, :, kh:kh + s * OH:s, kw:kw + s * OW:s])  # [B,C,OH,OW]
    p = jnp.stack(cols, axis=2)                  # [B, C, k*k, OH, OW]
    p = jnp.transpose(p, (0, 3, 4, 1, 2))        # [B, OH, OW, C, k*k]
    return p.reshape(B, OH * OW, C * k * k)


def _leaky(x):
    # LeakyReLU with PyTorch's default negative_slope=0.01.
    return jnp.maximum(x, 0.01 * x)


# ----------------------------------------------------------------------------
# Kernels
# ----------------------------------------------------------------------------
def _conv1_gemm_kernel(p_ref, w_ref, b_ref, o_ref):
    """conv1 as GEMM: [T, C*64] @ [C*64, 16] + b, LeakyReLU."""
    acc = jnp.dot(p_ref[...], w_ref[...], preferred_element_type=jnp.float32) + b_ref[...]
    o_ref[...] = jnp.maximum(acc, 0.01 * acc)


def _tail_kernel(h1_ref, w2_ref, b2_ref, w3_ref, b3_ref, wh_ref, bh_ref, o_ref,
                 *, num_outputs, is_discrete):
    """conv2(+flatten) + encoder dense + fused critic/actor heads for one batch tile.

    h1_ref : [TB, P1*16]    conv1 activations (spatial-major, channel-minor)
    w2_ref : [P1*16, 32*P2] conv2 folded to a dense matrix (exact), NCHW-flatten output order
    w3_ref : [32*P2, H]     encoder dense weight (transposed PyTorch layout)
    wh_ref : [H, 128]       fused heads: col 0 = critic, cols 1..num_outputs = actor, rest 0
    o_ref  : [TB, 128]      lane-dense output slab
    """
    # conv2 + flatten (single matmul against the folded dense weight) + LeakyReLU
    f = jnp.dot(h1_ref[...], w2_ref[...], preferred_element_type=jnp.float32) + b2_ref[...]
    f = jnp.maximum(f, 0.01 * f)
    # encoder dense + LeakyReLU
    hid = jnp.dot(f, w3_ref[...], preferred_element_type=jnp.float32) + b3_ref[...]
    hid = jnp.maximum(hid, 0.01 * hid)
    # fused critic + actor heads -> [TB, 128]
    head = jnp.dot(hid, wh_ref[...], preferred_element_type=jnp.float32) + bh_ref[...]

    if is_discrete:
        # Softmax over the actor columns only (cols 1..num_outputs), keeping value in col 0.
        col = jax.lax.broadcasted_iota(jnp.int32, head.shape, 1)
        amask = (col >= 1) & (col < 1 + num_outputs)
        logits = jnp.where(amask, head, jnp.float32(-1e30))
        m = jnp.max(logits, axis=1, keepdims=True)
        e = jnp.where(amask, jnp.exp(logits - m), 0.0)
        # approx=True would put this on the EUP at ~free cost; approx=False keeps exact parity.
        inv = pl.reciprocal(jnp.sum(e, axis=1, keepdims=True), approx=False)
        head = jnp.where(amask, e * inv, head)

    o_ref[...] = head


# ----------------------------------------------------------------------------
# Parameter init (PyTorch layouts) and packing into kernel layouts
# ----------------------------------------------------------------------------
def init_visual_actor_critic_params(key, in_channels, height, width,
                                    num_outputs, hidden_size, std=0.0):
    """Synthetic params in PyTorch layouts (conv: [O,I,KH,KW], linear: [out,in])."""
    oh1, ow1 = _conv_out(height, 8, 4), _conv_out(width, 8, 4)
    oh2, ow2 = _conv_out(oh1, 4, 2), _conv_out(ow1, 4, 2)
    final_flat = oh2 * ow2 * _C2_OUT
    ks = jax.random.split(key, 5)
    s = 0.1
    return {
        "w1": s * jax.random.normal(ks[0], (_C1_OUT, in_channels, 8, 8), jnp.float32),
        "b1": jnp.full((_C1_OUT,), 0.1, jnp.float32),
        "w2": s * jax.random.normal(ks[1], (_C2_OUT, _C1_OUT, 4, 4), jnp.float32),
        "b2": jnp.full((_C2_OUT,), 0.1, jnp.float32),
        "w3": s * jax.random.normal(ks[2], (hidden_size, final_flat), jnp.float32),
        "b3": jnp.full((hidden_size,), 0.1, jnp.float32),
        "wc": s * jax.random.normal(ks[3], (1, hidden_size), jnp.float32),
        "bc": jnp.full((1,), 0.1, jnp.float32),
        "wa": s * jax.random.normal(ks[4], (num_outputs, hidden_size), jnp.float32),
        "ba": jnp.full((num_outputs,), 0.1, jnp.float32),
        "log_std": jnp.full((1, num_outputs), std, jnp.float32),
    }


def pack_params(p, height, width):
    """One-time (host-side) repack of PyTorch-layout params into kernel-friendly layouts."""
    in_channels = p["w1"].shape[1]
    hidden = p["w3"].shape[0]
    num_outputs = p["wa"].shape[0]
    oh1, ow1 = _conv_out(height, 8, 4), _conv_out(width, 8, 4)
    oh2, ow2 = _conv_out(oh1, 4, 2), _conv_out(ow1, 4, 2)
    p2 = oh2 * ow2
    k1 = in_channels * 8 * 8
    assert 1 + num_outputs <= _HEAD_PAD

    # conv1 weight as a GEMM weight [C*64, 16] (feature order (c,kh,kw) matches _im2col_nchw)
    w1col = jnp.reshape(p["w1"], (_C1_OUT, k1)).T
    b1row = jnp.reshape(p["b1"], (1, _C1_OUT))

    # conv2 + flatten folded (exactly) into a dense matrix:
    #   rows  : s*16 + c_in   (conv1 spatial position s = oh1*OW1 + ow1, channel-minor)
    #   cols  : c_out*P2 + p  (== PyTorch NCHW flatten order, so w3 is used unpermuted)
    w2 = np.asarray(p["w2"], dtype=np.float32)             # [32, 16, 4, 4]
    w2dense = np.zeros((oh1 * ow1 * _C1_OUT, _C2_OUT * p2), np.float32)
    for oh in range(oh2):
        for ow in range(ow2):
            pidx = oh * ow2 + ow
            for kh in range(4):
                for kw in range(4):
                    s = (oh * 2 + kh) * ow1 + (ow * 2 + kw)
                    w2dense[s * _C1_OUT:(s + 1) * _C1_OUT, pidx::p2] = w2[:, :, kh, kw].T
    b2row = jnp.repeat(p["b2"], p2).reshape(1, _C2_OUT * p2)

    # encoder dense (flatten order already matches PyTorch, so just transpose)
    w3k = jnp.asarray(p["w3"]).T                            # [final_flat, hidden]
    b3row = jnp.reshape(p["b3"], (1, hidden))

    # fused critic/actor heads, zero-padded to a lane-dense 128-wide slab
    head_w = jnp.concatenate([p["wc"].T, p["wa"].T], axis=1)        # [hidden, 1+A]
    head_b = jnp.concatenate([p["bc"], p["ba"]]).reshape(1, -1)     # [1, 1+A]
    whead = jnp.zeros((hidden, _HEAD_PAD), jnp.float32).at[:, :1 + num_outputs].set(head_w)
    bhead = jnp.zeros((1, _HEAD_PAD), jnp.float32).at[:, :1 + num_outputs].set(head_b)

    return {
        "w1col": w1col, "b1row": b1row,
        "w2dense": jnp.asarray(w2dense), "b2row": b2row,
        "w3k": w3k, "b3row": b3row,
        "whead": whead, "bhead": bhead,
        "log_std": p["log_std"],
    }


# ----------------------------------------------------------------------------
# Forward wrapper
# ----------------------------------------------------------------------------
@functools.partial(jax.jit, static_argnames=("num_outputs", "is_discrete_action"))
def visual_actor_critic_forward(x, packed, num_outputs, is_discrete_action=False):
    """Pallas implementation of VisualActorCritic.forward.

    x: [B, C, H, W] (NCHW, like the PyTorch module).
    Returns (dist_params, value):
      continuous: dist_params = (mu, std)   -- Normal(mu, std)
      discrete:   dist_params = probs       -- Categorical(probs)
    """
    B, C, H, W = x.shape
    oh1, ow1 = _conv_out(H, 8, 4), _conv_out(W, 8, 4)
    p1 = oh1 * ow1
    k1 = C * 64
    ff1 = packed["w2dense"].shape[0]     # = p1 * 16
    flat2 = packed["w2dense"].shape[1]   # = 32 * OH2 * OW2
    hid = packed["w3k"].shape[1]

    # ---- Kernel 1: conv1 as GEMM over im2col patches, row-tiled + pipelined ----
    patches = _im2col_nchw(x, 8, 4).reshape(B * p1, k1)
    t1 = min(512, _round_up(B * p1, 8))
    patches = _pad_rows(patches, t1)
    r1 = patches.shape[0]
    h1 = pl.pallas_call(
        _conv1_gemm_kernel,
        out_shape=jax.ShapeDtypeStruct((r1, _C1_OUT), jnp.float32),
        grid=(r1 // t1,),
        in_specs=[
            pl.BlockSpec((t1, k1), lambda i: (i, 0)),
            pl.BlockSpec((k1, _C1_OUT), lambda i: (0, 0)),
            pl.BlockSpec((1, _C1_OUT), lambda i: (0, 0)),
        ],
        out_specs=pl.BlockSpec((t1, _C1_OUT), lambda i: (i, 0)),
        compiler_params=pltpu.CompilerParams(dimension_semantics=("parallel",)),
    )(patches, packed["w1col"], packed["b1row"])

    # ---- Kernel 2: conv2(+flatten) + dense + fused heads, batch-tiled + pipelined ----
    h1 = h1[:B * p1].reshape(B, ff1)         # per-sample (spatial, channel)-ordered row
    t2 = min(256, _round_up(B, 8))
    h1 = _pad_rows(h1, t2)
    bp = h1.shape[0]
    out = pl.pallas_call(
        functools.partial(_tail_kernel, num_outputs=num_outputs,
                          is_discrete=is_discrete_action),
        out_shape=jax.ShapeDtypeStruct((bp, _HEAD_PAD), jnp.float32),
        grid=(bp // t2,),
        in_specs=[
            pl.BlockSpec((t2, ff1), lambda i: (i, 0)),
            pl.BlockSpec((ff1, flat2), lambda i: (0, 0)),
            pl.BlockSpec((1, flat2), lambda i: (0, 0)),
            pl.BlockSpec((flat2, hid), lambda i: (0, 0)),
            pl.BlockSpec((1, hid), lambda i: (0, 0)),
            pl.BlockSpec((hid, _HEAD_PAD), lambda i: (0, 0)),
            pl.BlockSpec((1, _HEAD_PAD), lambda i: (0, 0)),
        ],
        out_specs=pl.BlockSpec((t2, _HEAD_PAD), lambda i: (i, 0)),
        compiler_params=pltpu.CompilerParams(dimension_semantics=("parallel",)),
    )(h1, packed["w2dense"], packed["b2row"], packed["w3k"], packed["b3row"],
      packed["whead"], packed["bhead"])

    value = out[:B, 0:1]
    act = out[:B, 1:1 + num_outputs]
    if not is_discrete_action:
        # std = log_std.exp().expand_as(mu): constant w.r.t. x, computed outside the kernel.
        std = jnp.broadcast_to(jnp.exp(packed["log_std"]), act.shape)
        return (act, std), value
    return act, value


# ----------------------------------------------------------------------------
# Pure-JAX reference (NCHW convs, PyTorch layouts) for correctness checking
# ----------------------------------------------------------------------------
def _reference_forward(x, p, is_discrete_action=False):
    prec = jax.lax.Precision.HIGHEST
    h = jax.lax.conv_general_dilated(
        x, p["w1"], (4, 4), "VALID",
        dimension_numbers=("NCHW", "OIHW", "NCHW"), precision=prec)
    h = _leaky(h + p["b1"][None, :, None, None])
    h = jax.lax.conv_general_dilated(
        h, p["w2"], (2, 2), "VALID",
        dimension_numbers=("NCHW", "OIHW", "NCHW"), precision=prec)
    h = _leaky(h + p["b2"][None, :, None, None])
    flat = h.reshape(h.shape[0], -1)                       # NCHW flatten, like PyTorch
    hidden = _leaky(jnp.dot(flat, p["w3"].T, precision=prec) + p["b3"])
    value = jnp.dot(hidden, p["wc"].T, precision=prec) + p["bc"]
    act = jnp.dot(hidden, p["wa"].T, precision=prec) + p["ba"]
    if is_discrete_action:
        return jax.nn.softmax(act, axis=1), value
    std = jnp.broadcast_to(jnp.exp(p["log_std"]), act.shape)
    return (act, std), value


if __name__ == "__main__":
    # Small shapes: 32x32x3 observations -> conv1 7x7x16 -> conv2 2x2x32 -> final_flat=128.
    batch, channels, height, width = 2, 3, 32, 32
    num_outputs, hidden_size = 4, 32

    key = jax.random.PRNGKey(0)
    kx, kp = jax.random.split(key)
    x = jax.random.normal(kx, (batch, channels, height, width), jnp.float32)
    params = init_visual_actor_critic_params(kp, channels, height, width,
                                             num_outputs, hidden_size, std=0.0)
    packed = pack_params(params, height, width)

    # Continuous-action path (module default): dist = Normal(mu, std).
    (mu, std), value = visual_actor_critic_forward(
        x, packed, num_outputs=num_outputs, is_discrete_action=False)
    jax.block_until_ready((mu, std, value))
    (mu_r, std_r), value_r = _reference_forward(x, params, False)
    np.testing.assert_allclose(np.asarray(mu), np.asarray(mu_r), rtol=1e-4, atol=1e-4)
    np.testing.assert_allclose(np.asarray(std), np.asarray(std_r), rtol=1e-5, atol=1e-6)
    np.testing.assert_allclose(np.asarray(value), np.asarray(value_r), rtol=1e-4, atol=1e-4)

    # Discrete-action path: dist = Categorical(probs).
    probs, value_d = visual_actor_critic_forward(
        x, packed, num_outputs=num_outputs, is_discrete_action=True)
    jax.block_until_ready((probs, value_d))
    probs_r, value_d_r = _reference_forward(x, params, True)
    np.testing.assert_allclose(np.asarray(probs), np.asarray(probs_r), rtol=1e-4, atol=1e-4)
    np.testing.assert_allclose(np.asarray(value_d), np.asarray(value_d_r), rtol=1e-4, atol=1e-4)

    print("KERNEL_OK")
</pallas_src>

<mosaic_0001>
module attributes {stable_mosaic.version = 11 : i64} {
  func.func @_conv1_gemm_kernel(%arg0: i32, %arg1: memref<104x192xf32, #tpu.memory_space<vmem>>, %arg2: memref<192x16xf32, #tpu.memory_space<vmem>>, %arg3: memref<1x16xf32, #tpu.memory_space<vmem>>, %arg4: memref<104x16xf32, #tpu.memory_space<vmem>>) attributes {dimension_semantics = [#tpu.dimension_semantics<parallel>], iteration_bounds = array<i64: 1>, scalar_prefetch = 0 : i64, scratch_operands = 0 : i64, tpu.core_type = #tpu.core_type<tc>, window_params = [{transform_indices = @transform_0, window_bounds = array<i64: 104, 192>}, {pipeline_mode = #tpu.pipeline_mode<synchronous>, transform_indices = @transform_1, window_bounds = array<i64: 192, 16>}, {pipeline_mode = #tpu.pipeline_mode<synchronous>, transform_indices = @transform_2, window_bounds = array<i64: 1, 16>}, {transform_indices = @transform_3, window_bounds = array<i64: 104, 16>}]} {
    %c0 = arith.constant 0 : index
    %c0_0 = arith.constant 0 : index
    %0 = vector.load %arg1[%c0, %c0_0] : memref<104x192xf32, #tpu.memory_space<vmem>>, vector<104x192xf32>
    %c0_1 = arith.constant 0 : index
    %c0_2 = arith.constant 0 : index
    %1 = vector.load %arg2[%c0_1, %c0_2] : memref<192x16xf32, #tpu.memory_space<vmem>>, vector<192x16xf32>
    %cst = arith.constant dense<0.000000e+00> : vector<104x16xf32>
    %2 = tpu.matmul %0, %1, %cst {dimension_numbers = #tpu.dot_dimension_numbers<[1], [0], [0], [1], [0, 0, 1, 1], [], []>} : vector<104x192xf32>, vector<192x16xf32>, vector<104x16xf32> -> vector<104x16xf32>
    %c0_3 = arith.constant 0 : index
    %c0_4 = arith.constant 0 : index
    %3 = vector.load %arg3[%c0_3, %c0_4] : memref<1x16xf32, #tpu.memory_space<vmem>>, vector<1x16xf32>
    %4 = vector.broadcast %3 : vector<1x16xf32> to vector<104x16xf32>
    %5 = arith.addf %2, %4 : vector<104x16xf32>
    %cst_5 = arith.constant 0.00999999977 : f32
    %6 = vector.broadcast %cst_5 : f32 to vector<104x16xf32>
    %7 = arith.mulf %6, %5 : vector<104x16xf32>
    %8 = arith.maximumf %5, %7 : vector<104x16xf32>
    %c0_6 = arith.constant 0 : index
    %c0_7 = arith.constant 0 : index
    %9 = vector.load %arg4[%c0_6, %c0_7] : memref<104x16xf32, #tpu.memory_space<vmem>>, vector<104x16xf32>
    tpu.vector_store %arg4[%c0_6, %c0_7], %8 {strides = array<i32>} : memref<104x16xf32, #tpu.memory_space<vmem>>, vector<104x16xf32>,
    return
  }
  func.func @transform_0(%arg0: i32) -> (i32, i32) {
    %c0_i32 = arith.constant 0 : i32
    %c0_i32_0 = arith.constant 0 : i32
    return %arg0, %c0_i32 : i32, i32
  }
  func.func @transform_1(%arg0: i32) -> (i32, i32) {
    %c0_i32 = arith.constant 0 : i32
    %c0_i32_0 = arith.constant 0 : i32
    %c0_i32_1 = arith.constant 0 : i32
    return %c0_i32, %c0_i32_0 : i32, i32
  }
  func.func @transform_2(%arg0: i32) -> (i32, i32) {
    %c0_i32 = arith.constant 0 : i32
    %c0_i32_0 = arith.constant 0 : i32
    %c0_i32_1 = arith.constant 0 : i32
    return %c0_i32, %c0_i32_0 : i32, i32
  }
  func.func @transform_3(%arg0: i32) -> (i32, i32) {
    %c0_i32 = arith.constant 0 : i32
    %c0_i32_0 = arith.constant 0 : i32
    return %arg0, %c0_i32 : i32, i32
  }
}

module attributes {stable_mosaic.version = 11 : i64} {
  func.func @_tail_kernel(%arg0: i32, %arg1: memref<8x784xf32, #tpu.memory_space<vmem>>, %arg2: memref<784x128xf32, #tpu.memory_space<vmem>>, %arg3: memref<1x128xf32, #tpu.memory_space<vmem>>, %arg4: memref<128x32xf32, #tpu.memory_space<vmem>>, %arg5: memref<1x32xf32, #tpu.memory_space<vmem>>, %arg6: memref<32x128xf32, #tpu.memory_space<vmem>>, %arg7: memref<1x128xf32, #tpu.memory_space<vmem>>, %arg8: memref<8x128xf32, #tpu.memory_space<vmem>>) attributes {dimension_semantics = [#tpu.dimension_semantics<parallel>], iteration_bounds = array<i64: 1>, scalar_prefetch = 0 : i64, scratch_operands = 0 : i64, tpu.core_type = #tpu.core_type<tc>, window_params = [{transform_indices = @transform_0, window_bounds = array<i64: 8, 784>}, {pipeline_mode = #tpu.pipeline_mode<synchronous>, transform_indices = @transform_1, window_bounds = array<i64: 784, 128>}, {pipeline_mode = #tpu.pipeline_mode<synchronous>, transform_indices = @transform_2, window_bounds = array<i64: 1, 128>}, {pipeline_mode = #tpu.pipeline_mode<synchronous>, transform_indices = @transform_3, window_bounds = array<i64: 128, 32>}, {pipeline_mode = #tpu.pipeline_mode<synchronous>, transform_indices = @transform_4, window_bounds = array<i64: 1, 32>}, {pipeline_mode = #tpu.pipeline_mode<synchronous>, transform_indices = @transform_5, window_bounds = array<i64: 32, 128>}, {pipeline_mode = #tpu.pipeline_mode<synchronous>, transform_indices = @transform_6, window_bounds = array<i64: 1, 128>}, {transform_indices = @transform_7, window_bounds = array<i64: 8, 128>}]} {
    %c0 = arith.constant 0 : index
    %c0_0 = arith.constant 0 : index
    %0 = vector.load %arg1[%c0, %c0_0] : memref<8x784xf32, #tpu.memory_space<vmem>>, vector<8x784xf32>
    %c0_1 = arith.constant 0 : index
    %c0_2 = arith.constant 0 : index
    %1 = vector.load %arg2[%c0_1, %c0_2] : memref<784x128xf32, #tpu.memory_space<vmem>>, vector<784x128xf32>
    %cst = arith.constant dense<0.000000e+00> : vector<8x128xf32>
    %2 = tpu.matmul %0, %1, %cst {dimension_numbers = #tpu.dot_dimension_numbers<[1], [0], [0], [1], [0, 0, 1, 1], [], []>} : vector<8x784xf32>, vector<784x128xf32>, vector<8x128xf32> -> vector<8x128xf32>
    %c0_3 = arith.constant 0 : index
    %c0_4 = arith.constant 0 : index
    %3 = vector.load %arg3[%c0_3, %c0_4] : memref<1x128xf32, #tpu.memory_space<vmem>>, vector<1x128xf32>
    %4 = vector.broadcast %3 : vector<1x128xf32> to vector<8x128xf32>
    %5 = arith.addf %2, %4 : vector<8x128xf32>
    %cst_5 = arith.constant 0.00999999977 : f32
    %6 = vector.broadcast %cst_5 : f32 to vector<8x128xf32>
    %7 = arith.mulf %6, %5 : vector<8x128xf32>
    %8 = arith.maximumf %5, %7 : vector<8x128xf32>
    %c0_6 = arith.constant 0 : index
    %c0_7 = arith.constant 0 : index
    %9 = vector.load %arg4[%c0_6, %c0_7] : memref<128x32xf32, #tpu.memory_space<vmem>>, vector<128x32xf32>
    %cst_8 = arith.constant dense<0.000000e+00> : vector<8x32xf32>
    %10 = tpu.matmul %8, %9, %cst_8 {dimension_numbers = #tpu.dot_dimension_numbers<[1], [0], [0], [1], [0, 0, 1, 1], [], []>} : vector<8x128xf32>, vector<128x32xf32>, vector<8x32xf32> -> vector<8x32xf32>
    %c0_9 = arith.constant 0 : index
    %c0_10 = arith.constant 0 : index
    %11 = vector.load %arg5[%c0_9, %c0_10] : memref<1x32xf32, #tpu.memory_space<vmem>>, vector<1x32xf32>
    %12 = vector.broadcast %11 : vector<1x32xf32> to vector<8x32xf32>
    %13 = arith.addf %10, %12 : vector<8x32xf32>
    %cst_11 = arith.constant 0.00999999977 : f32
    %14 = vector.broadcast %cst_11 : f32 to vector<8x32xf32>
    %15 = arith.mulf %14, %13 : vector<8x32xf32>
    %16 = arith.maximumf %13, %15 : vector<8x32xf32>
    %c0_12 = arith.constant 0 : index
    %c0_13 = arith.constant 0 : index
    %17 = vector.load %arg6[%c0_12, %c0_13] : memref<32x128xf32, #tpu.memory_space<vmem>>, vector<32x128xf32>
    %cst_14 = arith.constant dense<0.000000e+00> : vector<8x128xf32>
    %18 = tpu.matmul %16, %17, %cst_14 {dimension_numbers = #tpu.dot_dimension_numbers<[1], [0], [0], [1], [0, 0, 1, 1], [], []>} : vector<8x32xf32>, vector<32x128xf32>, vector<8x128xf32> -> vector<8x128xf32>
    %c0_15 = arith.constant 0 : index
    %c0_16 = arith.constant 0 : index
    %19 = vector.load %arg7[%c0_15, %c0_16] : memref<1x128xf32, #tpu.memory_space<vmem>>, vector<1x128xf32>
    %20 = vector.broadcast %19 : vector<1x128xf32> to vector<8x128xf32>
    %21 = arith.addf %18, %20 : vector<8x128xf32>
    %c0_17 = arith.constant 0 : index
    %c0_18 = arith.constant 0 : index
    %22 = vector.load %arg8[%c0_17, %c0_18] : memref<8x128xf32, #tpu.memory_space<vmem>>, vector<8x128xf32>
    tpu.vector_store %arg8[%c0_17, %c0_18], %21 {strides = array<i32>} : memref<8x128xf32, #tpu.memory_space<vmem>>, vector<8x128xf32>,
    return
  }
  func.func @transform_0(%arg0: i32) -> (i32, i32) {
    %c0_i32 = arith.constant 0 : i32
    %c0_i32_0 = arith.constant 0 : i32
    return %arg0, %c0_i32 : i32, i32
  }
  func.func @transform_1(%arg0: i32) -> (i32, i32) {
    %c0_i32 = arith.constant 0 : i32
    %c0_i32_0 = arith.constant 0 : i32
    %c0_i32_1 = arith.constant 0 : i32
    return %c0_i32, %c0_i32_0 : i32, i32
  }
  func.func @transform_2(%arg0: i32) -> (i32, i32) {
    %c0_i32 = arith.constant 0 : i32
    %c0_i32_0 = arith.constant 0 : i32
    %c0_i32_1 = arith.constant 0 : i32
    return %c0_i32, %c0_i32_0 : i32, i32
  }
  func.func @transform_3(%arg0: i32) -> (i32, i32) {
    %c0_i32 = arith.constant 0 : i32
    %c0_i32_0 = arith.constant 0 : i32
    %c0_i32_1 = arith.constant 0 : i32
    return %c0_i32, %c0_i32_0 : i32, i32
  }
  func.func @transform_4(%arg0: i32) -> (i32, i32) {
    %c0_i32 = arith.constant 0 : i32
    %c0_i32_0 = arith.constant 0 : i32
    %c0_i32_1 = arith.constant 0 : i32
    return %c0_i32, %c0_i32_0 : i32, i32
  }
  func.func @transform_5(%arg0: i32) -> (i32, i32) {
    %c0_i32 = arith.constant 0 : i32
    %c0_i32_0 = arith.constant 0 : i32
    %c0_i32_1 = arith.constant 0 : i32
    return %c0_i32, %c0_i32_0 : i32, i32
  }
  func.func @transform_6(%arg0: i32) -> (i32, i32) {
    %c0_i32 = arith.constant 0 : i32
    %c0_i32_0 = arith.constant 0 : i32
    %c0_i32_1 = arith.constant 0 : i32
    return %c0_i32, %c0_i32_0 : i32, i32
  }
  func.func @transform_7(%arg0: i32) -> (i32, i32) {
    %c0_i32 = arith.constant 0 : i32
    %c0_i32_0 = arith.constant 0 : i32
    return %arg0, %c0_i32 : i32, i32
  }
}

</mosaic_0001>

<bundles_post_ra>
// kernel: visual_actor_critic_forward.2
= control target key start
LH: loop header
LB: loop body
LE: loop exit
PB: predicated region body
PF: predicated region fallthrough
CT: control target
= control target key end

     0   :  { %v360_v0 = vmov 0.0|0.0   ;;  %vm71_vm0 = vcmask 523264   ;;  %vm267_vm1 = vcmask 130048   ;;  %s638_s1 = inlined_call_operand.vmem [shape: f32[192,16], index: 1, kind: input, shape index: {}]   ;;  %s639_s0 = inlined_call_operand.vmem [shape: f32[104,192], index: 0, kind: input, shape index: {}]   ;;  %s640_s2 = inlined_call_operand.vmem [shape: f32[1,16], index: 2, kind: input, shape index: {}]   ;;  %s641_s3 = inlined_call_operand.vmem [shape: f32[104,16], index: 3, kind: output, shape index: {}]  }
   0x1   :  { %299 = vmatprep.subr.bf16.mxu0 %v360_v0  ;;  %v40_v1 = vld [vmem:[%s638_s1] sm:$0xff]  ;;  %v41_v2 = vld [vmem:[%s638_s1 + $0x8] sm:$0xff]  ;;  %335 = vmatprep.subr.bf16.mxu1 %v360_v0  ;;  %v42_v3 = vld [vmem:[%s638_s1 + $0x10] sm:$0xff] }
   0x2   :  { %v300_v4 = vpack.c.bf16 %v41_v2, %v40_v1  ;;  %v43_v5 = vld [vmem:[%s638_s1 + $0x18] sm:$0xff]  ;;  %v44_v7 = vld [vmem:[%s638_s1 + $0x20] sm:$0xff]  ;;  %v45_v8 = vld [vmem:[%s638_s1 + $0x28] sm:$0xff] }
   0x3   :  { %v303_v6 = vpack.c.bf16 %v43_v5, %v42_v3  ;;  %v306_v9 = vpack.c.bf16 %v45_v8, %v44_v7  ;;  %v46_v10 = vld [vmem:[%s638_s1 + $0x30] sm:$0xff]  ;;  %v47_v11 = vld [vmem:[%s638_s1 + $0x38] sm:$0xff]  ;;  %v15_v12 = vld [vmem:[%s639_s0 + $0x8] sm:$0xff] }
   0x4   :  { %301 = vmatpush1.bf16.msra.mxu0 %v300_v4  ;;  %347 = vmatpush1.bf16.msra.mxu1 %v300_v4  ;;  %v29_v13 = vld [vmem:[%s639_s0 + $0x78] sm:$0xff]  ;;  %v309_v14 = vpack.c.bf16 %v47_v11, %v46_v10  ;;  %v48_v15 = vld [vmem:[%s638_s1 + $0x40] sm:$0xff]  ;;  %v49_v16 = vld [vmem:[%s638_s1 + $0x48] sm:$0xff] }
   0x5   :  { %302 = vmatprep.subr.bf16.mxu0 %v360_v0  ;;  %336 = vmatprep.subr.bf16.mxu1 %v360_v0  ;;  %v312_v17 = vpack.c.bf16 %v49_v16, %v48_v15  ;;  %v50_v18 = vld [vmem:[%s638_s1 + $0x50] sm:$0xff]  ;;  %v51_v19 = vld [vmem:[%s638_s1 + $0x58] sm:$0xff]  ;;  %v52_v21 = vld [vmem:[%s638_s1 + $0x60] sm:$0xff] }
   0x6   :  { %286 = vmatprep.mubr.msk.f32.mxu0 %vm71_vm0, %v15_v12  ;;  %293 = vmatprep.mubr.msk.f32.mxu1 %vm71_vm0, %v29_v13  ;;  %v315_v20 = vpack.c.bf16 %v51_v19, %v50_v18  ;;  %v53_v22 = vld [vmem:[%s638_s1 + $0x68] sm:$0xff]  ;;  %v54_v24 = vld [vmem:[%s638_s1 + $0x70] sm:$0xff]  ;;  %v55_v25 = vld [vmem:[%s638_s1 + $0x78] sm:$0xff] }
   0x7   :  { %v318_v23 = vpack.c.bf16 %v53_v22, %v52_v21  ;;  %v321_v26 = vpack.c.bf16 %v55_v25, %v54_v24  ;;  %v56_v27 = vld [vmem:[%s638_s1 + $0x80] sm:$0xff]  ;;  %v57_v28 = vld [vmem:[%s638_s1 + $0x88] sm:$0xff]  ;;  %v58_v30 = vld [vmem:[%s638_s1 + $0x90] sm:$0xff] }
   0x8   :  { %304 = vmatpush1.bf16.msra.mxu0 %v303_v6  ;;  %348 = vmatpush1.bf16.msra.mxu1 %v303_v6  ;;  %v324_v29 = vpack.c.bf16 %v57_v28, %v56_v27  ;;  %v59_v31 = vld [vmem:[%s638_s1 + $0x98] sm:$0xff]  ;;  %v60_v33 = vld [vmem:[%s638_s1 + $0xa0] sm:$0xff]  ;;  %v61_v34 = vld [vmem:[%s638_s1 + $0xa8] sm:$0xff] }
   0x9   :  { %305 = vmatprep.subr.bf16.mxu0 %v360_v0  ;;  %337 = vmatprep.subr.bf16.mxu1 %v360_v0  ;;  %v327_v32 = vpack.c.bf16 %v59_v31, %v58_v30  ;;  %v330_v35 = vpack.c.bf16 %v61_v34, %v60_v33  ;;  %v62_v36 = vld [vmem:[%s638_s1 + $0xb0] sm:$0xff]  ;;  %v63_v37 = vld [vmem:[%s638_s1 + $0xb8] sm:$0xff]  ;;  %v14_v39 = vld [vmem:[%s639_s0] sm:$0xff] }
   0xa   :  { %v333_v38 = vpack.c.bf16 %v63_v37, %v62_v36  ;;  %v28_v40 = vld [vmem:[%s639_s0 + $0x70] sm:$0xff]  ;;  %v17_v41 = vld [vmem:[%s639_s0 + $0x18] sm:$0xff]  ;;  %v31_v42 = vld [vmem:[%s639_s0 + $0x88] sm:$0xff] }
   0xb   :  { %v16_v43 = vld [vmem:[%s639_s0 + $0x10] sm:$0xff]  ;;  %v30_v44 = vld [vmem:[%s639_s0 + $0x80] sm:$0xff]  ;;  %v19_v45 = vld [vmem:[%s639_s0 + $0x28] sm:$0xff] }
   0xc   :  { %307 = vmatpush1.bf16.msra.mxu0 %v306_v9  ;;  %349 = vmatpush1.bf16.msra.mxu1 %v306_v9  ;;  %v33_v46 = vld [vmem:[%s639_s0 + $0x98] sm:$0xff]  ;;  %v18_v47 = vld [vmem:[%s639_s0 + $0x20] sm:$0xff]  ;;  %v32_v48 = vld [vmem:[%s639_s0 + $0x90] sm:$0xff] }
   0xd   :  { %308 = vmatprep.subr.bf16.mxu0 %v360_v0  ;;  %338 = vmatprep.subr.bf16.mxu1 %v360_v0  ;;  %v21_v49 = vld [vmem:[%s639_s0 + $0x38] sm:$0xff]  ;;  %v35_v50 = vld [vmem:[%s639_s0 + $0xa8] sm:$0xff]  ;;  %v20_v51 = vld [vmem:[%s639_s0 + $0x30] sm:$0xff] }
   0xe   :  { %v34_v52 = vld [vmem:[%s639_s0 + $0xa0] sm:$0xff]  ;;  %v23_v53 = vld [vmem:[%s639_s0 + $0x48] sm:$0xff]  ;;  %v37_v54 = vld [vmem:[%s639_s0 + $0xb8] sm:$0xff] }
   0xf   :  { %v22_v55 = vld [vmem:[%s639_s0 + $0x40] sm:$0xff]  ;;  %v36_v56 = vld [vmem:[%s639_s0 + $0xb0] sm:$0xff]  ;;  %v25_v57 = vld [vmem:[%s639_s0 + $0x58] sm:$0xff] }
  0x10   :  { %310 = vmatpush1.bf16.msra.mxu0 %v309_v14  ;;  %350 = vmatpush1.bf16.msra.mxu1 %v309_v14  ;;  %v39_v58 = vld [vmem:[%s639_s0 + $0xc8] sm:$0xff]  ;;  %v24_v59 = vld [vmem:[%s639_s0 + $0x50] sm:$0xff]  ;;  %v38_v60 = vld [vmem:[%s639_s0 + $0xc0] sm:$0xff] }
  0x11   :  { %311 = vmatprep.subr.bf16.mxu0 %v360_v0  ;;  %339 = vmatprep.subr.bf16.mxu1 %v360_v0  ;;  %v27_v61 = vld [vmem:[%s639_s0 + $0x68] sm:$0xff]  ;;  %v26_v62 = vld [vmem:[%s639_s0 + $0x60] sm:$0xff] }
  0x12   :  { %v571_v63 = vld [vmem:[%s640_s2] ss:$0 sm:$0xff] }
  0x14   :  { %313 = vmatpush1.bf16.msra.mxu0 %v312_v17  ;;  %351 = vmatpush1.bf16.msra.mxu1 %v312_v17 }
  0x15   :  { %314 = vmatprep.subr.bf16.mxu0 %v360_v0  ;;  %340 = vmatprep.subr.bf16.mxu1 %v360_v0 }
  0x18   :  { %316 = vmatpush1.bf16.msra.mxu0 %v315_v20  ;;  %352 = vmatpush1.bf16.msra.mxu1 %v315_v20 }
  0x19   :  { %317 = vmatprep.subr.bf16.mxu0 %v360_v0  ;;  %341 = vmatprep.subr.bf16.mxu1 %v360_v0 }
  0x1c   :  { %319 = vmatpush1.bf16.msra.mxu0 %v318_v23  ;;  %353 = vmatpush1.bf16.msra.mxu1 %v318_v23 }
  0x1d   :  { %320 = vmatprep.subr.bf16.mxu0 %v360_v0  ;;  %342 = vmatprep.subr.bf16.mxu1 %v360_v0 }
  0x20   :  { %322 = vmatpush1.bf16.msra.mxu0 %v321_v26  ;;  %354 = vmatpush1.bf16.msra.mxu1 %v321_v26 }
  0x21   :  { %323 = vmatprep.subr.bf16.mxu0 %v360_v0  ;;  %343 = vmatprep.subr.bf16.mxu1 %v360_v0 }
  0x24   :  { %325 = vmatpush1.bf16.msra.mxu0 %v324_v29  ;;  %355 = vmatpush1.bf16.msra.mxu1 %v324_v29 }
  0x25   :  { %326 = vmatprep.subr.bf16.mxu0 %v360_v0  ;;  %344 = vmatprep.subr.bf16.mxu1 %v360_v0 }
  0x28   :  { %328 = vmatpush1.bf16.msra.mxu0 %v327_v32  ;;  %356 = vmatpush1.bf16.msra.mxu1 %v327_v32 }
  0x29   :  { %329 = vmatprep.subr.bf16.mxu0 %v360_v0  ;;  %345 = vmatprep.subr.bf16.mxu1 %v360_v0 }
  0x2c   :  { %331 = vmatpush1.bf16.msra.mxu0 %v330_v35  ;;  %357 = vmatpush1.bf16.msra.mxu1 %v330_v35 }
  0x2d   :  { %332 = vmatprep.subr.bf16.mxu0 %v360_v0  ;;  %346 = vmatprep.subr.bf16.mxu1 %v360_v0 }
  0x30   :  { %334 = vmatpush1.bf16.msra.mxu0 %v333_v38  ;;  %358 = vmatpush1.bf16.msra.mxu1 %v333_v38 }
  0x33   :  { %176 = vmatmul.mubr.f32.vlgmr.msra.gmra.mrb[0].mxu0 %v14_v39  ;;  %211 = vmatmul.mubr.f32.vlgmr.msra.gmra.mrb[0].mxu1 %v28_v40 }
  0x34   :  { %287 = vmatprep.mubr.msk.f32.mxu0 %vm71_vm0, %v17_v41  ;;  %294 = vmatprep.mubr.msk.f32.mxu1 %vm71_vm0, %v31_v42 }
  0x37   :  { %181 = vmatmul.mubr.f32.gmra.mrb[2].mxu0 %v16_v43  ;;  %216 = vmatmul.mubr.f32.gmra.mrb[2].mxu1 %v30_v44 }
  0x38   :  { %288 = vmatprep.mubr.msk.f32.mxu0 %vm71_vm0, %v19_v45  ;;  %295 = vmatprep.mubr.msk.f32.mxu1 %vm71_vm0, %v33_v46 }
  0x3b   :  { %186 = vmatmul.mubr.f32.gmra.mrb[4].mxu0 %v18_v47  ;;  %221 = vmatmul.mubr.f32.gmra.mrb[4].mxu1 %v32_v48 }
  0x3c   :  { %289 = vmatprep.mubr.msk.f32.mxu0 %vm71_vm0, %v21_v49  ;;  %296 = vmatprep.mubr.msk.f32.mxu1 %vm71_vm0, %v35_v50 }
  0x3f   :  { %191 = vmatmul.mubr.f32.gmra.mrb[6].mxu0 %v20_v51  ;;  %226 = vmatmul.mubr.f32.gmra.mrb[6].mxu1 %v34_v52 }
  0x40   :  { %290 = vmatprep.mubr.msk.f32.mxu0 %vm71_vm0, %v23_v53  ;;  %297 = vmatprep.mubr.msk.f32.mxu1 %vm71_vm0, %v37_v54 }
  0x43   :  { %196 = vmatmul.mubr.f32.gmra.mrb[8].mxu0 %v22_v55  ;;  %231 = vmatmul.mubr.f32.gmra.mrb[8].mxu1 %v36_v56 }
  0x44   :  { %291 = vmatprep.mubr.msk.f32.mxu0 %vm71_vm0, %v25_v57  ;;  %298 = vmatprep.mubr.msk.f32.mxu1 %vm71_vm0, %v39_v58 }
  0x47   :  { %201 = vmatmul.mubr.f32.gmra.mrb[10].mxu0 %v24_v59  ;;  %236 = vmatmul.mubr.f32.gmra.mrb[10].mxu1 %v38_v60 }
  0x48   :  { %292 = vmatprep.mubr.msk.f32.mxu0 %vm71_vm0, %v27_v61 }
  0x4b   :  { %206 = vmatmul.mubr.f32.gmra.mrb[12].mxu0 %v26_v62 }
 0x106   :  { %v177_v0 = vpop.f32.mrb[0].mxu0  ;;  %v212_v1 = vpop.f32.mrb[0].mxu1 }
 0x107   :  { %v178_v2 = vadd.f32 %v571_v63, %v177_v0  ;;  %v179_v3 = vpop.f32.mrb[1].mxu0  ;;  %v213_v4 = vadd.f32 %v571_v63, %v212_v1  ;;  %v214_v5 = vpop.f32.mrb[1].mxu1 }
 0x109   :  { %v241_v6 = vmul.f32 0.01, %v178_v2  ;;  %v248_v7 = vmul.f32 0.01, %v213_v4 }
 0x10a   :  { %v182_v8 = vpop.f32.mrb[2].mxu0  ;;  %v217_v9 = vpop.f32.mrb[2].mxu1 }
 0x10b   :  { %v254_v10 = vmax.f32 %v178_v2, %v241_v6  ;;  %v261_v11 = vmax.f32 %v213_v4, %v248_v7  ;;  %v183_v12 = vadd.f32 %v571_v63, %v182_v8  ;;  %v184_v13 = vpop.f32.mrb[3].mxu0  ;;  %v218_v14 = vadd.f32 %v571_v63, %v217_v9  ;;  %v219_v15 = vpop.f32.mrb[3].mxu1 }
 0x10d   :  { %268 = vst.msk [vmem:[%s641_s3] sm:$0xff] %vm267_vm1, %v254_v10  ;;  %275 = vst.msk [vmem:[%s641_s3 + $0x38] sm:$0xff] %vm267_vm1, %v261_v11  ;;  %v242_v16 = vmul.f32 0.01, %v183_v12  ;;  %v249_v17 = vmul.f32 0.01, %v218_v14 }
 0x10e   :  { %v187_v18 = vpop.f32.mrb[4].mxu0  ;;  %v222_v19 = vpop.f32.mrb[4].mxu1 }
 0x10f   :  { %v255_v20 = vmax.f32 %v183_v12, %v242_v16  ;;  %v262_v21 = vmax.f32 %v218_v14, %v249_v17  ;;  %v188_v22 = vadd.f32 %v571_v63, %v187_v18  ;;  %v189_v23 = vpop.f32.mrb[5].mxu0  ;;  %v223_v24 = vadd.f32 %v571_v63, %v222_v19  ;;  %v224_v25 = vpop.f32.mrb[5].mxu1 }
 0x111   :  { %269 = vst.msk [vmem:[%s641_s3 + $0x8] sm:$0xff] %vm267_vm1, %v255_v20  ;;  %276 = vst.msk [vmem:[%s641_s3 + $0x40] sm:$0xff] %vm267_vm1, %v262_v21  ;;  %v243_v26 = vmul.f32 0.01, %v188_v22  ;;  %v250_v27 = vmul.f32 0.01, %v223_v24 }
 0x112   :  { %v192_v28 = vpop.f32.mrb[6].mxu0  ;;  %v227_v29 = vpop.f32.mrb[6].mxu1 }
 0x113   :  { %v256_v30 = vmax.f32 %v188_v22, %v243_v26  ;;  %v263_v31 = vmax.f32 %v223_v24, %v250_v27  ;;  %v193_v32 = vadd.f32 %v571_v63, %v192_v28  ;;  %v194_v33 = vpop.f32.mrb[7].mxu0  ;;  %v228_v34 = vadd.f32 %v571_v63, %v227_v29  ;;  %v229_v35 = vpop.f32.mrb[7].mxu1 }
 0x115   :  { %270 = vst.msk [vmem:[%s641_s3 + $0x10] sm:$0xff] %vm267_vm1, %v256_v30  ;;  %277 = vst.msk [vmem:[%s641_s3 + $0x48] sm:$0xff] %vm267_vm1, %v263_v31  ;;  %v244_v36 = vmul.f32 0.01, %v193_v32  ;;  %v251_v37 = vmul.f32 0.01, %v228_v34 }
 0x116   :  { %v197_v38 = vpop.f32.mrb[8].mxu0  ;;  %v232_v39 = vpop.f32.mrb[8].mxu1 }
 0x117   :  { %v257_v40 = vmax.f32 %v193_v32, %v244_v36  ;;  %v264_v41 = vmax.f32 %v228_v34, %v251_v37  ;;  %v198_v42 = vadd.f32 %v571_v63, %v197_v38  ;;  %v199_v43 = vpop.f32.mrb[9].mxu0  ;;  %v233_v44 = vadd.f32 %v571_v63, %v232_v39  ;;  %v234_v45 = vpop.f32.mrb[9].mxu1 }
 0x119   :  { %271 = vst.msk [vmem:[%s641_s3 + $0x18] sm:$0xff] %vm267_vm1, %v257_v40  ;;  %278 = vst.msk [vmem:[%s641_s3 + $0x50] sm:$0xff] %vm267_vm1, %v264_v41  ;;  %v245_v46 = vmul.f32 0.01, %v198_v42  ;;  %v252_v47 = vmul.f32 0.01, %v233_v44 }
 0x11a   :  { %v202_v48 = vpop.f32.mrb[10].mxu0  ;;  %v237_v49 = vpop.f32.mrb[10].mxu1 }
 0x11b   :  { %v258_v50 = vmax.f32 %v198_v42, %v245_v46  ;;  %v265_v51 = vmax.f32 %v233_v44, %v252_v47  ;;  %v203_v52 = vadd.f32 %v571_v63, %v202_v48  ;;  %v204_v53 = vpop.f32.mrb[11].mxu0  ;;  %v238_v54 = vadd.f32 %v571_v63, %v237_v49  ;;  %v239_v55 = vpop.f32.mrb[11].mxu1 }
 0x11d   :  { %272 = vst.msk [vmem:[%s641_s3 + $0x20] sm:$0xff] %vm267_vm1, %v258_v50  ;;  %279 = vst.msk [vmem:[%s641_s3 + $0x58] sm:$0xff] %vm267_vm1, %v265_v51  ;;  %v246_v56 = vmul.f32 0.01, %v203_v52  ;;  %v253_v57 = vmul.f32 0.01, %v238_v54 }
 0x11e   :  { %v207_v58 = vpop.f32.mrb[12].mxu0 }
 0x11f   :  { %v259_v59 = vmax.f32 %v203_v52, %v246_v56  ;;  %v266_v60 = vmax.f32 %v238_v54, %v253_v57  ;;  %v208_v61 = vadd.f32 %v571_v63, %v207_v58  ;;  %v209_v62 = vpop.f32.mrb[13].mxu0 }
 0x121   :  { %273 = vst.msk [vmem:[%s641_s3 + $0x28] sm:$0xff] %vm267_vm1, %v259_v59  ;;  %280 = vst.msk [vmem:[%s641_s3 + $0x60] sm:$0xff] %vm267_vm1, %v266_v60  ;;  %v247_v0 = vmul.f32 0.01, %v208_v61 }
 0x123   :  { %v260_v1 = vmax.f32 %v208_v61, %v247_v0 }
 0x125   :  { %274 = vst.msk [vmem:[%s641_s3 + $0x30] sm:$0xff] %vm267_vm1, %v260_v1 }

// kernel: visual_actor_critic_forward.3
= control target key start
LH: loop header
LB: loop body
LE: loop exit
PB: predicated region body
PF: predicated region fallthrough
CT: control target
= control target key end

     0   :  { %vm930_vm0 = vmmov 0   ;;  %vm138_vm1 = vcmask 130048   ;;  %vm530_vm2 = vcmask 261120   ;;  %s1373_s1 = inlined_call_operand.vmem [shape: f32[784,128], index: 1, kind: input, shape index: {}]   ;;  %s1374_s0 = inlined_call_operand.vmem [shape: f32[8,784], index: 0, kind: input, shape index: {}]   ;;  %s1375_s3 = inlined_call_operand.vmem [shape: f32[128,32], index: 3, kind: input, shape index: {}]   ;;  %s1376_s2 = inlined_call_operand.vmem [shape: f32[1,128], index: 2, kind: input, shape index: {}]   ;;  %s1377_s5 = inlined_call_operand.vmem [shape: f32[32,128], index: 5, kind: input, shape index: {}]   ;;  %s1378_s4 = inlined_call_operand.vmem [shape: f32[1,32], index: 4, kind: input, shape index: {}]   ;;  %s1379_s6 = inlined_call_operand.vmem [shape: f32[1,128], index: 6, kind: input, shape index: {}]   ;;  %s1380_s7 = inlined_call_operand.vmem [shape: f32[8,128], index: 7, kind: output, shape index: {}]  }
   0x1   :  { %v49_v0 = vld [vmem:[%s1373_s1 + $0x80] sm:$0xff]  ;;  %v50_v1 = vld [vmem:[%s1373_s1 + $0x88] sm:$0xff]  ;;  %v51_v11 = vld [vmem:[%s1373_s1 + $0x90] sm:$0xff] }
   0x2   :  { %v33_v2 = vld [vmem:[%s1373_s1] sm:$0xff]  ;;  %v797_v3 = vpack.c.bf16 %v50_v1, %v49_v0  ;;  %v34_v4 = vld [vmem:[%s1373_s1 + $0x8] sm:$0xff]  ;;  %v52_v13 = vld [vmem:[%s1373_s1 + $0x98] sm:$0xff] }
   0x3   :  { %v81_v5 = vld [vmem:[%s1373_s1 + $0x180] sm:$0xff]  ;;  %v82_v6 = vld [vmem:[%s1373_s1 + $0x188] sm:$0xff]  ;;  %v799_v7 = vpack.c.bf16 %v34_v4, %v33_v2  ;;  %v35_v14 = vld [vmem:[%s1373_s1 + $0x10] sm:$0xff]  ;;  %v801_v16 = vpack.c.bf16 %v52_v13, %v51_v11 }
   0x4   :  { %v829_v8 = vpack.c.bf16 %v82_v6, %v81_v5  ;;  %v65_v9 = vld [vmem:[%s1373_s1 + $0x100] sm:$0xff]  ;;  %v66_v10 = vld [vmem:[%s1373_s1 + $0x108] sm:$0xff]  ;;  %798 = vmatprep.subr.bf16.mxu0 %v797_v3  ;;  %v36_v15 = vld [vmem:[%s1373_s1 + $0x18] sm:$0xff] }
   0x5   :  { %v831_v12 = vpack.c.bf16 %v66_v10, %v65_v9  ;;  %800 = vmatpush3.bf16.msra.mxu0 %v799_v7  ;;  %v803_v17 = vpack.c.bf16 %v36_v15, %v35_v14  ;;  %v83_v18 = vld [vmem:[%s1373_s1 + $0x190] sm:$0xff]  ;;  %v84_v19 = vld [vmem:[%s1373_s1 + $0x198] sm:$0xff]  ;;  %v53_v23 = vld [vmem:[%s1373_s1 + $0xa0] sm:$0xff] }
   0x6   :  { %830 = vmatprep.subr.bf16.mxu1 %v829_v8  ;;  %v67_v20 = vld [vmem:[%s1373_s1 + $0x110] sm:$0xff]  ;;  %v833_v21 = vpack.c.bf16 %v84_v19, %v83_v18  ;;  %v68_v22 = vld [vmem:[%s1373_s1 + $0x118] sm:$0xff]  ;;  %v54_v24 = vld [vmem:[%s1373_s1 + $0xa8] sm:$0xff]  ;;  %802 = vmatprep.subr.bf16.mxu0 %v801_v16 }
   0x7   :  { %832 = vmatpush3.bf16.msra.mxu1 %v831_v12  ;;  %v835_v25 = vpack.c.bf16 %v68_v22, %v67_v20  ;;  %v805_v26 = vpack.c.bf16 %v54_v24, %v53_v23  ;;  %v37_v27 = vld [vmem:[%s1373_s1 + $0x20] sm:$0xff]  ;;  %v38_v28 = vld [vmem:[%s1373_s1 + $0x28] sm:$0xff]  ;;  %v55_v35 = vld [vmem:[%s1373_s1 + $0xb0] sm:$0xff] }
   0x8   :  { %v85_v29 = vld [vmem:[%s1373_s1 + $0x1a0] sm:$0xff]  ;;  %834 = vmatprep.subr.bf16.mxu1 %v833_v21  ;;  %v86_v30 = vld [vmem:[%s1373_s1 + $0x1a8] sm:$0xff]  ;;  %v807_v33 = vpack.c.bf16 %v38_v28, %v37_v27  ;;  %v56_v36 = vld [vmem:[%s1373_s1 + $0xb8] sm:$0xff] }
   0x9   :  { %v69_v31 = vld [vmem:[%s1373_s1 + $0x120] sm:$0xff]  ;;  %v70_v32 = vld [vmem:[%s1373_s1 + $0x128] sm:$0xff]  ;;  %804 = vmatpush3.bf16.msra.mxu0 %v803_v17  ;;  %v837_v34 = vpack.c.bf16 %v86_v30, %v85_v29  ;;  %v39_v37 = vld [vmem:[%s1373_s1 + $0x30] sm:$0xff]  ;;  %v809_v39 = vpack.c.bf16 %v56_v36, %v55_v35 }
   0xa   :  { %806 = vmatprep.subr.bf16.mxu0 %v805_v26  ;;  %v839_v38 = vpack.c.bf16 %v70_v32, %v69_v31  ;;  %v40_v40 = vld [vmem:[%s1373_s1 + $0x38] sm:$0xff]  ;;  %v87_v41 = vld [vmem:[%s1373_s1 + $0x1b0] sm:$0xff]  ;;  %v57_v46 = vld [vmem:[%s1373_s1 + $0xc0] sm:$0xff] }
   0xb   :  { %836 = vmatpush3.bf16.msra.mxu1 %v835_v25  ;;  %v88_v42 = vld [vmem:[%s1373_s1 + $0x1b8] sm:$0xff]  ;;  %v71_v44 = vld [vmem:[%s1373_s1 + $0x130] sm:$0xff]  ;;  %v58_v47 = vld [vmem:[%s1373_s1 + $0xc8] sm:$0xff]  ;;  %v811_v48 = vpack.c.bf16 %v40_v40, %v39_v37 }
   0xc   :  { %838 = vmatprep.subr.bf16.mxu1 %v837_v34  ;;  %v841_v43 = vpack.c.bf16 %v88_v42, %v87_v41  ;;  %v72_v45 = vld [vmem:[%s1373_s1 + $0x138] sm:$0xff]  ;;  %v89_v49 = vld [vmem:[%s1373_s1 + $0x1c0] sm:$0xff]  ;;  %v90_v50 = vld [vmem:[%s1373_s1 + $0x1c8] sm:$0xff]  ;;  %v813_v52 = vpack.c.bf16 %v58_v47, %v57_v46 }
   0xd   :  { %808 = vmatpush3.bf16.msra.mxu0 %v807_v33  ;;  %v843_v51 = vpack.c.bf16 %v72_v45, %v71_v44  ;;  %v41_v53 = vld [vmem:[%s1373_s1 + $0x40] sm:$0xff]  ;;  %v42_v54 = vld [vmem:[%s1373_s1 + $0x48] sm:$0xff]  ;;  %v845_v56 = vpack.c.bf16 %v90_v50, %v89_v49  ;;  %v59_v58 = vld [vmem:[%s1373_s1 + $0xd0] sm:$0xff]  ;;  %v929_v50 = vmov 0.0|0.0  }
   0xe   :  { %810 = vmatprep.subr.bf16.mxu0 %v809_v39  ;;  %v73_v55 = vld [vmem:[%s1373_s1 + $0x140] sm:$0xff]  ;;  %v74_v57 = vld [vmem:[%s1373_s1 + $0x148] sm:$0xff]  ;;  %v60_v59 = vld [vmem:[%s1373_s1 + $0xd8] sm:$0xff]  ;;  %v815_v62 = vpack.c.bf16 %v42_v54, %v41_v53 }
   0xf   :  { %840 = vmatpush3.bf16.msra.mxu1 %v839_v38  ;;  %v91_v60 = vld [vmem:[%s1373_s1 + $0x1d0] sm:$0xff]  ;;  %v92_v61 = vld [vmem:[%s1373_s1 + $0x1d8] sm:$0xff]  ;;  %v847_v63 = vpack.c.bf16 %v74_v57, %v73_v55  ;;  %v817_v0 = vpack.c.bf16 %v60_v59, %v59_v58  ;;  %v61_v6 = vld [vmem:[%s1373_s1 + $0xe0] sm:$0xff] }
  0x10   :  { %842 = vmatprep.subr.bf16.mxu1 %v841_v43  ;;  %v43_v1 = vld [vmem:[%s1373_s1 + $0x50] sm:$0xff]  ;;  %v44_v2 = vld [vmem:[%s1373_s1 + $0x58] sm:$0xff]  ;;  %v849_v4 = vpack.c.bf16 %v92_v61, %v91_v60  ;;  %v62_v7 = vld [vmem:[%s1373_s1 + $0xe8] sm:$0xff]  ;;  %v931_v60 = vmov 0.0  }
  0x11   :  { %812 = vmatpush3.bf16.msra.mxu0 %v811_v48  ;;  %v75_v3 = vld [vmem:[%s1373_s1 + $0x150] sm:$0xff]  ;;  %v76_v5 = vld [vmem:[%s1373_s1 + $0x158] sm:$0xff]  ;;  %v93_v8 = vld [vmem:[%s1373_s1 + $0x1e0] sm:$0xff]  ;;  %v819_v10 = vpack.c.bf16 %v44_v2, %v43_v1  ;;  %v821_v14 = vpack.c.bf16 %v62_v7, %v61_v6 }
  0x12   :  { %814 = vmatprep.subr.bf16.mxu0 %v813_v52  ;;  %v94_v9 = vld [vmem:[%s1373_s1 + $0x1e8] sm:$0xff]  ;;  %v45_v11 = vld [vmem:[%s1373_s1 + $0x60] sm:$0xff]  ;;  %v851_v13 = vpack.c.bf16 %v76_v5, %v75_v3  ;;  %v63_v19 = vld [vmem:[%s1373_s1 + $0xf0] sm:$0xff] }
  0x13   :  { %844 = vmatpush3.bf16.msra.mxu1 %v843_v51  ;;  %v27_v12 = vld [vmem:[%s1374_s0 + $0x8] sm:$0xff]  ;;  %v77_v16 = vld [vmem:[%s1373_s1 + $0x160] sm:$0xff]  ;;  %v853_v18 = vpack.c.bf16 %v94_v9, %v93_v8  ;;  %v64_v20 = vld [vmem:[%s1373_s1 + $0xf8] sm:$0xff] }
  0x14   :  { %846 = vmatprep.subr.bf16.mxu1 %v845_v56  ;;  %v46_v15 = vld [vmem:[%s1373_s1 + $0x68] sm:$0xff]  ;;  %206 = vmatprep.mubr.f32.mxu0 %v27_v12  ;;  %v29_v21 = vld [vmem:[%s1374_s0 + $0x18] sm:$0xff]  ;;  %v95_v22 = vld [vmem:[%s1373_s1 + $0x1f0] sm:$0xff]  ;;  %v825_v26 = vpack.c.bf16 %v64_v20, %v63_v19 }
  0x15   :  { %816 = vmatpush3.bf16.msra.mxu0 %v815_v62  ;;  %v78_v17 = vld [vmem:[%s1373_s1 + $0x168] sm:$0xff]  ;;  %v96_v23 = vld [vmem:[%s1373_s1 + $0x1f8] sm:$0xff]  ;;  %276 = vmatprep.mubr.f32.mxu1 %v29_v21  ;;  %v823_v24 = vpack.c.bf16 %v46_v15, %v45_v11  ;;  %v47_v27 = vld [vmem:[%s1373_s1 + $0x70] sm:$0xff] }
  0x16   :  { %818 = vmatprep.subr.bf16.mxu0 %v817_v0  ;;  %v855_v25 = vpack.c.bf16 %v78_v17, %v77_v16  ;;  %v48_v28 = vld [vmem:[%s1373_s1 + $0x78] sm:$0xff]  ;;  %v79_v29 = vld [vmem:[%s1373_s1 + $0x170] sm:$0xff]  ;;  %v857_v30 = vpack.c.bf16 %v96_v23, %v95_v22  ;;  %v113_v32 = vld [vmem:[%s1373_s1 + $0x280] sm:$0xff] }
  0x17   :  { %848 = vmatpush3.bf16.msra.mxu1 %v847_v63  ;;  %v80_v31 = vld [vmem:[%s1373_s1 + $0x178] sm:$0xff]  ;;  %v114_v33 = vld [vmem:[%s1373_s1 + $0x288] sm:$0xff]  ;;  %v827_v34 = vpack.c.bf16 %v48_v28, %v47_v27  ;;  %v97_v37 = vld [vmem:[%s1373_s1 + $0x200] sm:$0xff] }
  0x18   :  { %850 = vmatprep.subr.bf16.mxu1 %v849_v4  ;;  %v859_v35 = vpack.c.bf16 %v80_v31, %v79_v29  ;;  %v861_v36 = vpack.c.bf16 %v114_v33, %v113_v32  ;;  %v98_v38 = vld [vmem:[%s1373_s1 + $0x208] sm:$0xff]  ;;  %v115_v39 = vld [vmem:[%s1373_s1 + $0x290] sm:$0xff]  ;;  %v116_v40 = vld [vmem:[%s1373_s1 + $0x298] sm:$0xff] }
  0x19   :  { %820 = vmatpush3.bf16.msra.mxu0 %v819_v10  ;;  %v26_v41 = vld [vmem:[%s1374_s0] sm:$0xff]  ;;  %v863_v42 = vpack.c.bf16 %v98_v38, %v97_v37  ;;  %v28_v43 = vld [vmem:[%s1374_s0 + $0x10] sm:$0xff]  ;;  %v865_v45 = vpack.c.bf16 %v116_v40, %v115_v39  ;;  %v100_v46 = vld [vmem:[%s1373_s1 + $0x218] sm:$0xff] }
  0x1a   :  { %822 = vmatprep.subr.bf16.mxu0 %v821_v14  ;;  %v99_v44 = vld [vmem:[%s1373_s1 + $0x210] sm:$0xff]  ;;  %v117_v47 = vld [vmem:[%s1373_s1 + $0x2a0] sm:$0xff]  ;;  %v118_v48 = vld [vmem:[%s1373_s1 + $0x2a8] sm:$0xff] }
  0x1b   :  { %852 = vmatpush3.bf16.msra.mxu1 %v851_v13  ;;  %v31_v49 = vld [vmem:[%s1374_s0 + $0x28] sm:$0xff]  ;;  %v129_v51 = vld [vmem:[%s1373_s1 + $0x300] sm:$0xff]  ;;  %v867_v54 = vpack.c.bf16 %v100_v46, %v99_v44  ;;  %v869_v55 = vpack.c.bf16 %v118_v48, %v117_v47  ;;  %v119_v58 = vld [vmem:[%s1373_s1 + $0x2b0] sm:$0xff] }
  0x1c   :  { %854 = vmatprep.subr.bf16.mxu1 %v853_v18  ;;  %v130_v52 = vld [vmem:[%s1373_s1 + $0x308] sm:$0xff]  ;;  %v101_v56 = vld [vmem:[%s1373_s1 + $0x220] sm:$0xff]  ;;  %v120_v59 = vld [vmem:[%s1373_s1 + $0x2b8] sm:$0xff] }
  0x1d   :  { %824 = vmatpush3.bf16.msra.mxu0 %v823_v24  ;;  %v894_v53 = vpack.c.bf16 %v130_v52, %v129_v51  ;;  %v102_v57 = vld [vmem:[%s1373_s1 + $0x228] sm:$0xff]  ;;  %v32_v61 = vld [vmem:[%s1374_s0 + $0x30] sm:$0xff]  ;;  %v873_v63 = vpack.c.bf16 %v120_v59, %v119_v58  ;;  %v104_v1 = vld [vmem:[%s1373_s1 + $0x238] sm:$0xff] }
  0x1e   :  { %826 = vmatprep.subr.bf16.mxu0 %v825_v26  ;;  %v871_v62 = vpack.c.bf16 %v102_v57, %v101_v56  ;;  %v103_v0 = vld [vmem:[%s1373_s1 + $0x230] sm:$0xff]  ;;  %v121_v2 = vld [vmem:[%s1373_s1 + $0x2c0] sm:$0xff]  ;;  %v122_v3 = vld [vmem:[%s1373_s1 + $0x2c8] sm:$0xff] }
  0x1f   :  { %856 = vmatpush3.bf16.msra.mxu1 %v855_v25  ;;  %v875_v4 = vpack.c.bf16 %v104_v1, %v103_v0  ;;  %v877_v5 = vpack.c.bf16 %v122_v3, %v121_v2  ;;  %v105_v6 = vld [vmem:[%s1373_s1 + $0x240] sm:$0xff]  ;;  %v106_v7 = vld [vmem:[%s1373_s1 + $0x248] sm:$0xff]  ;;  %v123_v8 = vld [vmem:[%s1373_s1 + $0x2d0] sm:$0xff] }
  0x20   :  { %858 = vmatprep.subr.bf16.mxu1 %v857_v30  ;;  %v124_v9 = vld [vmem:[%s1373_s1 + $0x2d8] sm:$0xff]  ;;  %v879_v10 = vpack.c.bf16 %v106_v7, %v105_v6  ;;  %v107_v12 = vld [vmem:[%s1373_s1 + $0x250] sm:$0xff]  ;;  %v125_v14 = vld [vmem:[%s1373_s1 + $0x2e0] sm:$0xff] }
  0x21   :  { %828 = vmatpush3.bf16.msra.mxu0 %v827_v34  ;;  %v881_v11 = vpack.c.bf16 %v124_v9, %v123_v8  ;;  %v108_v13 = vld [vmem:[%s1373_s1 + $0x258] sm:$0xff]  ;;  %v126_v15 = vld [vmem:[%s1373_s1 + $0x2e8] sm:$0xff]  ;;  %v109_v18 = vld [vmem:[%s1373_s1 + $0x260] sm:$0xff] }
  0x22   :  { %862 = vmatprep.subr.bf16.mxu0 %v861_v36  ;;  %v883_v16 = vpack.c.bf16 %v108_v13, %v107_v12  ;;  %v885_v17 = vpack.c.bf16 %v126_v15, %v125_v14  ;;  %v110_v19 = vld [vmem:[%s1373_s1 + $0x268] sm:$0xff]  ;;  %v127_v20 = vld [vmem:[%s1373_s1 + $0x2f0] sm:$0xff]  ;;  %v128_v21 = vld [vmem:[%s1373_s1 + $0x2f8] sm:$0xff] }
  0x23   :  { %860 = vmatpush3.bf16.msra.mxu1 %v859_v35  ;;  %v887_v22 = vpack.c.bf16 %v110_v19, %v109_v18  ;;  %v889_v23 = vpack.c.bf16 %v128_v21, %v127_v20  ;;  %v111_v24 = vld [vmem:[%s1373_s1 + $0x270] sm:$0xff]  ;;  %v112_v25 = vld [vmem:[%s1373_s1 + $0x278] sm:$0xff]  ;;  %v30_v27 = vld [vmem:[%s1374_s0 + $0x20] sm:$0xff] }
  0x24   :  { %893 = vmatprep.subr.bf16.mxu1 %v929_v50  ;;  %207 = vmatmul.mubr.f32.vlgmr.msra.gmra.mrb[0].mxu0 %v26_v41  ;;  %v891_v26 = vpack.c.bf16 %v112_v25, %v111_v24  ;;  %v424_v28 = vld [vmem:[%s1375_s3] sm:$0xff]  ;;  %v425_v29 = vld [vmem:[%s1375_s3 + $0x8] sm:$0xff]  ;;  %v426_v30 = vld [vmem:[%s1375_s3 + $0x10] sm:$0xff] }
  0x25   :  { %864 = vmatpush3.bf16.msra.mxu0 %v863_v42  ;;  %346 = vmatprep.mubr.f32.mxu0 %v31_v49  ;;  %v897_v31 = vpack.c.bf16 %v425_v29, %v424_v28  ;;  %v427_v32 = vld [vmem:[%s1375_s3 + $0x18] sm:$0xff]  ;;  %v428_v34 = vld [vmem:[%s1375_s3 + $0x20] sm:$0xff]  ;;  %v429_v35 = vld [vmem:[%s1375_s3 + $0x28] sm:$0xff] }
  0x26   :  { %277 = vmatmul.mubr.f32.vlgmr.msra.gmra.mrb[0].mxu1 %v28_v43  ;;  %866 = vmatprep.subr.bf16.mxu0 %v865_v45  ;;  %v900_v33 = vpack.c.bf16 %v427_v32, %v426_v30  ;;  %v903_v36 = vpack.c.bf16 %v429_v35, %v428_v34  ;;  %v430_v37 = vld [vmem:[%s1375_s3 + $0x30] sm:$0xff]  ;;  %v431_v38 = vld [vmem:[%s1375_s3 + $0x38] sm:$0xff]  ;;  %v432_v40 = vld [vmem:[%s1375_s3 + $0x40] sm:$0xff] }
  0x27   :  { %895 = vmatpush3.bf16.msra.mxu1 %v894_v53  ;;  %748 = vmatprep.mubr.msk.f32.mxu1 %vm930_vm0, %v931_v60  ;;  %v906_v39 = vpack.c.bf16 %v431_v38, %v430_v37  ;;  %v433_v41 = vld [vmem:[%s1375_s3 + $0x48] sm:$0xff]  ;;  %v434_v43 = vld [vmem:[%s1375_s3 + $0x50] sm:$0xff]  ;;  %v435_v44 = vld [vmem:[%s1375_s3 + $0x58] sm:$0xff] }
  0x28   :  { %896 = vmatprep.subr.bf16.mxu1 %v929_v50  ;;  %v909_v42 = vpack.c.bf16 %v433_v41, %v432_v40  ;;  %v912_v45 = vpack.c.bf16 %v435_v44, %v434_v43  ;;  %v436_v46 = vld [vmem:[%s1375_s3 + $0x60] sm:$0xff]  ;;  %v437_v47 = vld [vmem:[%s1375_s3 + $0x68] sm:$0xff]  ;;  %v438_v49 = vld [vmem:[%s1375_s3 + $0x70] sm:$0xff] }
  0x29   :  { %868 = vmatpush3.bf16.msra.mxu0 %v867_v54  ;;  %v915_v48 = vpack.c.bf16 %v437_v47, %v436_v46  ;;  %v439_v51 = vld [vmem:[%s1375_s3 + $0x78] sm:$0xff]  ;;  %v609_v54 = vld [vmem:[%s1376_s2] ss:$0 sm:$0xff]  ;;  %v520_v8 = vld [vmem:[%s1377_s5 + $0x8] sm:$0xff] }
  0x2a   :  { %870 = vmatprep.subr.bf16.mxu0 %v869_v55  ;;  %749 = vmatmul.mubr.msk.f32.vlgmr.msra.gmra.mrb[2].mxu1 %vm138_vm1, %v32_v61  ;;  %v918_v52 = vpack.c.bf16 %v439_v51, %v438_v49  ;;  %v519_v7 = vld [vmem:[%s1377_s5] sm:$0xff] }
  0x2b   :  { %783 = vmatprep.mubr.msk.f32.mxu1 %vm930_vm0, %v931_v60  ;;  %898 = vmatpush3.bf16.msra.mxu1 %v897_v31  ;;  %v921_v9 = vpack.c.bf16 %v520_v8, %v519_v7  ;;  %v611_v13 = vld [vmem:[%s1378_s4] ss:$0 sm:$0xff] }
  0x2c   :  { %899 = vmatprep.subr.bf16.mxu1 %v929_v50  ;;  %v612_v18 = vld [vmem:[%s1379_s6] ss:$0 sm:$0xff] }
  0x2d   :  { %872 = vmatpush3.bf16.msra.mxu0 %v871_v62 }
  0x2e   :  { %874 = vmatprep.subr.bf16.mxu0 %v873_v63 }
  0x2f   :  { %901 = vmatpush3.bf16.msra.mxu1 %v900_v33 }
  0x30   :  { %902 = vmatprep.subr.bf16.mxu1 %v929_v50 }
  0x31   :  { %876 = vmatpush3.bf16.msra.mxu0 %v875_v4 }
  0x32   :  { %878 = vmatprep.subr.bf16.mxu0 %v877_v5 }
  0x33   :  { %904 = vmatpush3.bf16.msra.mxu1 %v903_v36 }
  0x34   :  { %905 = vmatprep.subr.bf16.mxu1 %v929_v50 }
  0x35   :  { %880 = vmatpush3.bf16.msra.mxu0 %v879_v10  ;;  %v521_v10 = vld [vmem:[%s1377_s5 + $0x10] sm:$0xff] }
  0x36   :  { %882 = vmatprep.subr.bf16.mxu0 %v881_v11  ;;  %v522_v11 = vld [vmem:[%s1377_s5 + $0x18] sm:$0xff] }
  0x37   :  { %907 = vmatpush3.bf16.msra.mxu1 %v906_v39  ;;  %v924_v12 = vpack.c.bf16 %v522_v11, %v521_v10 }
  0x38   :  { %908 = vmatprep.subr.bf16.mxu1 %v929_v50 }
  0x39   :  { %884 = vmatpush3.bf16.msra.mxu0 %v883_v16 }
  0x3a   :  { %886 = vmatprep.subr.bf16.mxu0 %v885_v17 }
  0x3b   :  { %910 = vmatpush3.bf16.msra.mxu1 %v909_v42 }
  0x3c   :  { %911 = vmatprep.subr.bf16.mxu1 %v929_v50 }
  0x3d   :  { %888 = vmatpush3.bf16.msra.mxu0 %v887_v22 }
  0x3e   :  { %890 = vmatprep.subr.bf16.mxu0 %v889_v23 }
  0x3f   :  { %913 = vmatpush3.bf16.msra.mxu1 %v912_v45 }
  0x40   :  { %914 = vmatprep.subr.bf16.mxu1 %v929_v50 }
  0x41   :  { %892 = vmatpush3.bf16.msra.mxu0 %v891_v26 }
  0x42   :  { %920 = vmatprep.subr.bf16.mxu0 %v929_v50 }
  0x43   :  { %916 = vmatpush3.bf16.msra.mxu1 %v915_v48 }
  0x44   :  { %347 = vmatmul.mubr.f32.vlgmr.msra.gmra.mrb[2].mxu0 %v30_v27  ;;  %917 = vmatprep.subr.bf16.mxu1 %v929_v50 }
  0x45   :  { %794 = vmatprep.mubr.msk.f32.mxu0 %vm930_vm0, %v931_v60  ;;  %922 = vmatpush3.bf16.msra.mxu0 %v921_v9 }
  0x46   :  { %923 = vmatprep.subr.bf16.mxu0 %v929_v50 }
  0x47   :  { %919 = vmatpush3.bf16.msra.mxu1 %v918_v52 }
  0x49   :  { %925 = vmatpush3.bf16.msra.mxu0 %v924_v12 }
  0xf7   :  { %v646_v53 = vpop.f32.mrb[0].mxu0 }
  0xf8   :  { %v647_v55 = vpop.f32.mrb[1].mxu0 }
  0xf9   :  { %v681_v56 = vpop.f32.mrb[0].mxu1  ;;  %v648_v57 = vadd.f32 %v647_v55, %v646_v53 }
  0xfa   :  { %v682_v58 = vpop.f32.mrb[1].mxu1 }
  0xfb   :  { %v683_v59 = vadd.f32 %v682_v58, %v681_v56  ;;  %v209_v60 = vadd.f32 %v648_v57, %v609_v54 }
  0xfd   :  { %v279_v61 = vadd.f32 %v683_v59, %v209_v60  ;;  %v418_v62 = vpop.f32.mrb[2].mxu1 }
  0xfe   :  { %v750_v63 = vpop.f32.mrb[3].mxu1 }
 0x117   :  { %v716_v0 = vpop.f32.mrb[2].mxu0 }
 0x118   :  { %v717_v1 = vpop.f32.mrb[3].mxu0 }
 0x119   :  { %v718_v2 = vadd.f32 %v717_v1, %v716_v0 }
 0x11b   :  { %v349_v3 = vadd.f32 %v718_v2, %v279_v61 }
 0x11d   :  { %v419_v4 = vadd.f32 %v418_v62, %v349_v3 }
 0x11f   :  { %v422_v5 = vmul.f32 0.01, %v419_v4 }
 0x121   :  { %v423_v6 = vmax.f32 %v419_v4, %v422_v5 }
 0x123   :  { %784 = vmatmul.mubr.f32.vlgmr.msra.gmra.mrb[4].mxu1 %v423_v6 }
 0x1f6   :  { %v513_v14 = vpop.f32.mrb[4].mxu1 }
 0x1f7   :  { %v514_v15 = vadd.f32 %v611_v13, %v513_v14  ;;  %v785_v16 = vpop.f32.mrb[5].mxu1 }
 0x1f9   :  { %v517_v17 = vmul.f32 0.01, %v514_v15 }
 0x1fb   :  { %v518_v50 = vmax.f32 %v514_v15, %v517_v17 }
 0x1fd   :  { %795 = vmatmul.mubr.msk.f32.vlgmr.msra.gmra.mrb[4].mxu0 %vm530_vm2, %v518_v50 }
 0x2d0   :  { %v600_v19 = vpop.f32.mrb[4].mxu0 }
 0x2d1   :  { %v601_v20 = vadd.f32 %v612_v18, %v600_v19  ;;  %v796_v21 = vpop.f32.mrb[5].mxu0 }
 0x2d3   :  { %604 = vst [vmem:[%s1380_s7] sm:$0xff] %v601_v20 }

</bundles_post_ra>
